<compile_context>
chip_gen: v7x
topology: tpu7x:2x2x1
jax: 0.10.0
libtpu: 0.0.40
codegen_flags: <defaults>
</compile_context>

<pallas_src>
import functools

import jax
import jax.numpy as jnp
from jax.experimental import pallas as pl
from jax.experimental.pallas import tpu as pltpu

EPS = 1e-5


# --------------------------------------------------------------------------- #
# Kernel helpers
# --------------------------------------------------------------------------- #
def _lane_group_sum(v, group):
    """v: (1, L) with L = W*group lanes (lane = wpos*group + c).  Returns (1, L)
    where every lane holds the sum over all lanes with the same channel c, i.e.
    the per-channel sum already broadcast across the lane axis (no reshape)."""
    L = v.shape[-1]
    reps = L // group
    if (reps & (reps - 1)) == 0:        # power-of-two: log-step roll-reduce (XLU)
        step = group
        while step < L:
            v = v + pltpu.roll(v, step, axis=1)
            step *= 2
        return v
    acc = v                              # general fallback: linear roll-accumulate
    for k in range(1, reps):
        acc = acc + pltpu.roll(v, k * group, axis=1)
    return acc


def _bias_bn_relu(y, p, m, cout):
    """y: (R, W*Cout) f32 lane-dense conv output (bias not yet added).
    p: (3, W*Cout) = [bias, gamma, beta], each tiled W times along lanes.
    m: reduction size per channel (N*H*W).  One-pass biased batch stats."""
    y = y + p[0:1, :]                                           # conv bias
    s1 = _lane_group_sum(jnp.sum(y, axis=0, keepdims=True), cout)
    s2 = _lane_group_sum(jnp.sum(y * y, axis=0, keepdims=True), cout)
    mean = s1 * (1.0 / m)
    var = s2 * (1.0 / m) - mean * mean                          # biased (PyTorch training BN)
    inv = jax.lax.rsqrt(var + EPS)                              # EUP, lane-dense
    return jnp.maximum((y - mean) * inv * p[1:2, :] + p[2:3, :], 0.0)


# --------------------------------------------------------------------------- #
# Fused ConvBlock kernel
# --------------------------------------------------------------------------- #
def _conv_block_kernel(x_ref, gw1_ref, p1_ref, gw2_ref, p2_ref, out_ref,
                       xpad1_ref, xpad2_ref, *, n, h, w, cin, cout):
    m = n * h * w

    # ---- stage 1: halo-pad(h) -> 3 ky slabs -> ONE bf16 MXU matmul -> BN/ReLU
    zrow1 = jnp.zeros((n, 1, w * cin), jnp.float32)
    xpad1_ref[:, 0:1, :] = zrow1                        # top halo only
    xpad1_ref[:, h + 1:h + 2, :] = zrow1                # bottom halo only
    xpad1_ref[:, 1:h + 1, :] = x_ref[...]               # interior, lane offset 0

    patches1 = jnp.concatenate(
        [xpad1_ref[:, ky:ky + h, :] for ky in range(3)],
        axis=-1).reshape(n * h, 3 * w * cin).astype(jnp.bfloat16)
    y1 = jnp.dot(patches1, gw1_ref[...], preferred_element_type=jnp.float32)
    z1 = _bias_bn_relu(y1, p1_ref[...], m, cout)        # (N*H, W*Cout) f32

    # ---- stage 2 --------------------------------------------------------------
    zrow2 = jnp.zeros((n, 1, w * cout), jnp.float32)
    xpad2_ref[:, 0:1, :] = zrow2
    xpad2_ref[:, h + 1:h + 2, :] = zrow2
    xpad2_ref[:, 1:h + 1, :] = z1.reshape(n, h, w * cout)   # full-width aligned store

    patches2 = jnp.concatenate(
        [xpad2_ref[:, ky:ky + h, :] for ky in range(3)],
        axis=-1).reshape(n * h, 3 * w * cout).astype(jnp.bfloat16)
    y2 = jnp.dot(patches2, gw2_ref[...], preferred_element_type=jnp.float32)
    out_ref[...] = _bias_bn_relu(y2, p2_ref[...], m, cout)   # lane-dense store


# --------------------------------------------------------------------------- #
# Wrapper
# --------------------------------------------------------------------------- #
def _folded_conv_weights(w_hwio, w_spatial, dtype=jnp.bfloat16):
    """(3,3,Cin,Cout) -> (3*W*Cin, W*Cout) im2col weights with the horizontal
    (kx) taps folded into the W-block structure.  SAME padding: contributions
    whose output column falls outside [0, W) are dropped (offset identity)."""
    kh, kw, cin, cout = w_hwio.shape
    blocks = []
    for ky in range(kh):
        blk = jnp.zeros((w_spatial, cin, w_spatial, cout), jnp.float32)
        for kx in range(kw):
            # input column wi contributes to output column wo = wi + 1 - kx
            eye = jnp.eye(w_spatial, k=1 - kx, dtype=jnp.float32)   # eye[wi, wo]
            blk = blk + jnp.einsum('wv,io->wivo', eye,
                                   w_hwio[ky, kx].astype(jnp.float32))
        blocks.append(blk.reshape(w_spatial * cin, w_spatial * cout))
    return jnp.concatenate(blocks, axis=0).astype(dtype)


def conv_block_forward(x_nchw, params):
    """Full ConvBlock forward.  Input/output are NCHW (PyTorch convention)."""
    n, cin, h, w = x_nchw.shape
    cout = params["w1"].shape[-1]

    # NHWC, then fold (W, C) into the lane axis: rows = (n, h), lanes = (w, c).
    x_rows = jnp.transpose(x_nchw, (0, 2, 3, 1)).reshape(n, h, w * cin)

    gw1 = _folded_conv_weights(params["w1"], w)           # (3*W*Cin,  W*Cout) bf16
    gw2 = _folded_conv_weights(params["w2"], w)           # (3*W*Cout, W*Cout) bf16

    def tile_params(b, g, beta):                          # per-channel -> (3, W*Cout)
        return jnp.stack([jnp.tile(b, w), jnp.tile(g, w),
                          jnp.tile(beta, w)]).astype(jnp.float32)

    p1 = tile_params(params["b1"], params["g1"], params["beta1"])
    p2 = tile_params(params["b2"], params["g2"], params["beta2"])

    kernel = functools.partial(_conv_block_kernel,
                               n=n, h=h, w=w, cin=cin, cout=cout)
    vmem = pl.BlockSpec(memory_space=pltpu.MemorySpace.VMEM)

    flops = (2 * n * h * (3 * w * cin) * (w * cout)
             + 2 * n * h * (3 * w * cout) * (w * cout))
    bytes_accessed = (4 * x_rows.size + 2 * (gw1.size + gw2.size)
                      + 4 * (p1.size + p2.size) + 4 * n * h * w * cout)

    out_rows = pl.pallas_call(
        kernel,
        out_shape=jax.ShapeDtypeStruct((n * h, w * cout), jnp.float32),
        in_specs=[vmem] * 5,
        out_specs=vmem,
        scratch_shapes=[
            pltpu.VMEM((n, h + 2, w * cin), jnp.float32),    # h-padded input
            pltpu.VMEM((n, h + 2, w * cout), jnp.float32),   # h-padded stage-1 out
        ],
        compiler_params=pltpu.CompilerParams(
            vmem_limit_bytes=32 * 1024 * 1024),              # safe on v5e/v6e/v7x
        cost_estimate=pl.CostEstimate(flops=flops,
                                      transcendentals=2 * w * cout,
                                      bytes_accessed=bytes_accessed),
    )(x_rows, gw1, p1, gw2, p2)

    out_nhwc = out_rows.reshape(n, h, w, cout)
    return jnp.transpose(out_nhwc, (0, 3, 1, 2))          # -> NCHW


# --------------------------------------------------------------------------- #
# Pure-JAX references (verification only)
# --------------------------------------------------------------------------- #
def _ref_stage(x_nchw, w_oihw, b, gamma, beta, matmul_dtype):
    xq = x_nchw.astype(matmul_dtype).astype(jnp.float32)
    wq = w_oihw.astype(matmul_dtype).astype(jnp.float32)
    y = jax.lax.conv_general_dilated(
        xq, wq, window_strides=(1, 1), padding="SAME",
        dimension_numbers=("NCHW", "OIHW", "NCHW"),
        precision=jax.lax.Precision.HIGHEST)
    y = y + b[None, :, None, None]
    mean = jnp.mean(y, axis=(0, 2, 3), keepdims=True)
    var = jnp.mean((y - mean) ** 2, axis=(0, 2, 3), keepdims=True)
    y = (y - mean) * jax.lax.rsqrt(var + EPS)
    y = y * gamma[None, :, None, None] + beta[None, :, None, None]
    return jnp.maximum(y, 0.0)


def _ref_forward(x_nchw, p, matmul_dtype=jnp.float32):
    w1_oihw = jnp.transpose(p["w1"], (3, 2, 0, 1))
    w2_oihw = jnp.transpose(p["w2"], (3, 2, 0, 1))
    x = _ref_stage(x_nchw, w1_oihw, p["b1"], p["g1"], p["beta1"], matmul_dtype)
    x = _ref_stage(x, w2_oihw, p["b2"], p["g2"], p["beta2"], matmul_dtype)
    return x


if __name__ == "__main__":
    N, INT_C, OUT_C, H, W = 2, 4, 8, 16, 16

    key = jax.random.PRNGKey(0)
    k1, k2, k3, k4, k5, k6, k7, k8, kx = jax.random.split(key, 9)

    # Conv weights in HWIO (3,3,Cin,Cout).  gamma/beta kept non-trivial so the
    # tiled-affine path is actually exercised (PyTorch default init is 1/0).
    params = {
        "w1": 0.1 * jax.random.normal(k1, (3, 3, INT_C, OUT_C), jnp.float32),
        "b1": 0.1 * jax.random.normal(k2, (OUT_C,), jnp.float32),
        "g1": 1.0 + 0.1 * jax.random.normal(k3, (OUT_C,), jnp.float32),
        "beta1": 0.1 * jax.random.normal(k4, (OUT_C,), jnp.float32),
        "w2": 0.1 * jax.random.normal(k5, (3, 3, OUT_C, OUT_C), jnp.float32),
        "b2": 0.1 * jax.random.normal(k6, (OUT_C,), jnp.float32),
        "g2": 1.0 + 0.1 * jax.random.normal(k7, (OUT_C,), jnp.float32),
        "beta2": 0.1 * jax.random.normal(k8, (OUT_C,), jnp.float32),
    }

    x = jax.random.normal(kx, (N, INT_C, H, W), jnp.float32)   # NCHW like PyTorch

    out = jax.block_until_ready(jax.jit(conv_block_forward)(x, params))
    assert out.shape == (N, OUT_C, H, W), out.shape

    # Tight check vs. a reference that applies the SAME bf16 quantization to the
    # MXU inputs (isolates padding / kx-folded im2col / BN / ReLU correctness).
    ref_bf16 = jax.block_until_ready(_ref_forward(x, params, jnp.bfloat16))
    err_bf16 = float(jnp.max(jnp.abs(out - ref_bf16)))
    assert err_bf16 < 5e-3, err_bf16

    # Sanity check vs. the pure-f32 PyTorch-semantics reference; the deviation
    # is only the standard bf16 MXU-input quantization.
    ref_f32 = jax.block_until_ready(_ref_forward(x, params, jnp.float32))
    err_f32 = float(jnp.max(jnp.abs(out - ref_f32)))
    assert err_f32 < 5e-2, err_f32

    print("KERNEL_OK")
</pallas_src>

<mosaic_0001>
module attributes {stable_mosaic.version = 11 : i64} {
  func.func @_conv_block_kernel(%arg0: memref<2x16x64xf32, #tpu.memory_space<vmem>>, %arg1: memref<192x128xbf16, #tpu.memory_space<vmem>>, %arg2: memref<3x128xf32, #tpu.memory_space<vmem>>, %arg3: memref<384x128xbf16, #tpu.memory_space<vmem>>, %arg4: memref<3x128xf32, #tpu.memory_space<vmem>>, %arg5: memref<32x128xf32, #tpu.memory_space<vmem>>, %arg6: memref<2x18x64xf32, #tpu.memory_space<vmem>>, %arg7: memref<2x18x128xf32, #tpu.memory_space<vmem>>) attributes {dimension_semantics = [], scalar_prefetch = 0 : i64, scratch_operands = 2 : i64, tpu.core_type = #tpu.core_type<tc>} {
    %cst = arith.constant 0.000000e+00 : f32
    %0 = vector.broadcast %cst : f32 to vector<2x1x64xf32>
    %c0 = arith.constant 0 : index
    %c0_0 = arith.constant 0 : index
    %c0_1 = arith.constant 0 : index
    %1 = vector.load %arg6[%c0, %c0_0, %c0_1] : memref<2x18x64xf32, #tpu.memory_space<vmem>>, vector<2x1x64xf32>
    tpu.vector_store %arg6[%c0, %c0_0, %c0_1], %0 {strides = array<i32>} : memref<2x18x64xf32, #tpu.memory_space<vmem>>, vector<2x1x64xf32>,
    %c0_2 = arith.constant 0 : index
    %c17 = arith.constant 17 : index
    %c0_3 = arith.constant 0 : index
    %2 = vector.load %arg6[%c0_2, %c17, %c0_3] : memref<2x18x64xf32, #tpu.memory_space<vmem>>, vector<2x1x64xf32>
    tpu.vector_store %arg6[%c0_2, %c17, %c0_3], %0 {strides = array<i32>} : memref<2x18x64xf32, #tpu.memory_space<vmem>>, vector<2x1x64xf32>,
    %c0_4 = arith.constant 0 : index
    %c0_5 = arith.constant 0 : index
    %c0_6 = arith.constant 0 : index
    %3 = vector.load %arg0[%c0_4, %c0_5, %c0_6] : memref<2x16x64xf32, #tpu.memory_space<vmem>>, vector<2x16x64xf32>
    %c0_7 = arith.constant 0 : index
    %c1 = arith.constant 1 : index
    %c0_8 = arith.constant 0 : index
    %4 = vector.load %arg6[%c0_7, %c1, %c0_8] : memref<2x18x64xf32, #tpu.memory_space<vmem>>, vector<2x16x64xf32>
    tpu.vector_store %arg6[%c0_7, %c1, %c0_8], %3 {strides = array<i32>} : memref<2x18x64xf32, #tpu.memory_space<vmem>>, vector<2x16x64xf32>,
    %c0_9 = arith.constant 0 : index
    %c0_10 = arith.constant 0 : index
    %c0_11 = arith.constant 0 : index
    %5 = vector.load %arg6[%c0_9, %c0_10, %c0_11] : memref<2x18x64xf32, #tpu.memory_space<vmem>>, vector<2x16x64xf32>
    %c0_12 = arith.constant 0 : index
    %c1_13 = arith.constant 1 : index
    %c0_14 = arith.constant 0 : index
    %6 = vector.load %arg6[%c0_12, %c1_13, %c0_14] : memref<2x18x64xf32, #tpu.memory_space<vmem>>, vector<2x16x64xf32>
    %c0_15 = arith.constant 0 : index
    %c2 = arith.constant 2 : index
    %c0_16 = arith.constant 0 : index
    %7 = vector.load %arg6[%c0_15, %c2, %c0_16] : memref<2x18x64xf32, #tpu.memory_space<vmem>>, vector<2x16x64xf32>
    %8 = tpu.concatenate %5, %6, %7 in 2 : vector<2x16x64xf32>, vector<2x16x64xf32>, vector<2x16x64xf32> -> vector<2x16x192xf32>
    %9 = vector.shape_cast %8 : vector<2x16x192xf32> to vector<32x192xf32>
    %10 = arith.truncf %9 : vector<32x192xf32> to vector<32x192xbf16>
    %c0_17 = arith.constant 0 : index
    %c0_18 = arith.constant 0 : index
    %11 = vector.load %arg1[%c0_17, %c0_18] : memref<192x128xbf16, #tpu.memory_space<vmem>>, vector<192x128xbf16>
    %cst_19 = arith.constant dense<0.000000e+00> : vector<32x128xf32>
    %12 = tpu.matmul %10, %11, %cst_19 {dimension_numbers = #tpu.dot_dimension_numbers<[1], [0], [0], [1], [0, 0, 1, 1], [], []>} : vector<32x192xbf16>, vector<192x128xbf16>, vector<32x128xf32> -> vector<32x128xf32>
    %c0_20 = arith.constant 0 : index
    %c0_21 = arith.constant 0 : index
    %13 = vector.load %arg2[%c0_20, %c0_21] : memref<3x128xf32, #tpu.memory_space<vmem>>, vector<3x128xf32>
    %14 = vector.extract_strided_slice %13 {offsets = [0, 0], sizes = [1, 128], strides = [1, 1]} : vector<3x128xf32> to vector<1x128xf32>
    %15 = vector.broadcast %14 : vector<1x128xf32> to vector<32x128xf32>
    %16 = arith.addf %12, %15 : vector<32x128xf32>
    %cst_22 = arith.constant dense<0.000000e+00> : vector<128xf32>
    %17 = vector.multi_reduction <add>, %16, %cst_22 [0] : vector<32x128xf32> to vector<128xf32>
    %18 = vector.shape_cast %17 : vector<128xf32> to vector<1x128xf32>
    %c8_i32 = arith.constant 8 : i32
    %19 = tpu.dynamic_rotate %18 by %c8_i32 dim 1 : vector<1x128xf32>, i32 -> vector<1x128xf32>
    %20 = arith.addf %18, %19 : vector<1x128xf32>
    %c16_i32 = arith.constant 16 : i32
    %21 = tpu.dynamic_rotate %20 by %c16_i32 dim 1 : vector<1x128xf32>, i32 -> vector<1x128xf32>
    %22 = arith.addf %20, %21 : vector<1x128xf32>
    %c32_i32 = arith.constant 32 : i32
    %23 = tpu.dynamic_rotate %22 by %c32_i32 dim 1 : vector<1x128xf32>, i32 -> vector<1x128xf32>
    %24 = arith.addf %22, %23 : vector<1x128xf32>
    %c64_i32 = arith.constant 64 : i32
    %25 = tpu.dynamic_rotate %24 by %c64_i32 dim 1 : vector<1x128xf32>, i32 -> vector<1x128xf32>
    %26 = arith.addf %24, %25 : vector<1x128xf32>
    %27 = arith.mulf %16, %16 : vector<32x128xf32>
    %cst_23 = arith.constant dense<0.000000e+00> : vector<128xf32>
    %28 = vector.multi_reduction <add>, %27, %cst_23 [0] : vector<32x128xf32> to vector<128xf32>
    %29 = vector.shape_cast %28 : vector<128xf32> to vector<1x128xf32>
    %c8_i32_24 = arith.constant 8 : i32
    %30 = tpu.dynamic_rotate %29 by %c8_i32_24 dim 1 : vector<1x128xf32>, i32 -> vector<1x128xf32>
    %31 = arith.addf %29, %30 : vector<1x128xf32>
    %c16_i32_25 = arith.constant 16 : i32
    %32 = tpu.dynamic_rotate %31 by %c16_i32_25 dim 1 : vector<1x128xf32>, i32 -> vector<1x128xf32>
    %33 = arith.addf %31, %32 : vector<1x128xf32>
    %c32_i32_26 = arith.constant 32 : i32
    %34 = tpu.dynamic_rotate %33 by %c32_i32_26 dim 1 : vector<1x128xf32>, i32 -> vector<1x128xf32>
    %35 = arith.addf %33, %34 : vector<1x128xf32>
    %c64_i32_27 = arith.constant 64 : i32
    %36 = tpu.dynamic_rotate %35 by %c64_i32_27 dim 1 : vector<1x128xf32>, i32 -> vector<1x128xf32>
    %37 = arith.addf %35, %36 : vector<1x128xf32>
    %cst_28 = arith.constant 0.001953125 : f32
    %38 = vector.broadcast %cst_28 : f32 to vector<1x128xf32>
    %39 = arith.mulf %26, %38 : vector<1x128xf32>
    %cst_29 = arith.constant 0.001953125 : f32
    %40 = vector.broadcast %cst_29 : f32 to vector<1x128xf32>
    %41 = arith.mulf %37, %40 : vector<1x128xf32>
    %42 = arith.mulf %39, %39 : vector<1x128xf32>
    %43 = arith.subf %41, %42 : vector<1x128xf32>
    %cst_30 = arith.constant 9.99999974E-6 : f32
    %44 = vector.broadcast %cst_30 : f32 to vector<1x128xf32>
    %45 = arith.addf %43, %44 : vector<1x128xf32>
    %46 = math.rsqrt %45 : vector<1x128xf32>
    %47 = vector.broadcast %39 : vector<1x128xf32> to vector<32x128xf32>
    %48 = arith.subf %16, %47 : vector<32x128xf32>
    %49 = vector.broadcast %46 : vector<1x128xf32> to vector<32x128xf32>
    %50 = arith.mulf %48, %49 : vector<32x128xf32>
    %51 = vector.extract_strided_slice %13 {offsets = [1, 0], sizes = [1, 128], strides = [1, 1]} : vector<3x128xf32> to vector<1x128xf32>
    %52 = vector.broadcast %51 : vector<1x128xf32> to vector<32x128xf32>
    %53 = arith.mulf %50, %52 : vector<32x128xf32>
    %54 = vector.extract_strided_slice %13 {offsets = [2, 0], sizes = [1, 128], strides = [1, 1]} : vector<3x128xf32> to vector<1x128xf32>
    %55 = vector.broadcast %54 : vector<1x128xf32> to vector<32x128xf32>
    %56 = arith.addf %53, %55 : vector<32x128xf32>
    %cst_31 = arith.constant 0.000000e+00 : f32
    %57 = vector.broadcast %cst_31 : f32 to vector<32x128xf32>
    %58 = arith.maximumf %56, %57 : vector<32x128xf32>
    %cst_32 = arith.constant 0.000000e+00 : f32
    %59 = vector.broadcast %cst_32 : f32 to vector<2x1x128xf32>
    %c0_33 = arith.constant 0 : index
    %c0_34 = arith.constant 0 : index
    %c0_35 = arith.constant 0 : index
    %60 = vector.load %arg7[%c0_33, %c0_34, %c0_35] : memref<2x18x128xf32, #tpu.memory_space<vmem>>, vector<2x1x128xf32>
    tpu.vector_store %arg7[%c0_33, %c0_34, %c0_35], %59 {strides = array<i32>} : memref<2x18x128xf32, #tpu.memory_space<vmem>>, vector<2x1x128xf32>,
    %c0_36 = arith.constant 0 : index
    %c17_37 = arith.constant 17 : index
    %c0_38 = arith.constant 0 : index
    %61 = vector.load %arg7[%c0_36, %c17_37, %c0_38] : memref<2x18x128xf32, #tpu.memory_space<vmem>>, vector<2x1x128xf32>
    tpu.vector_store %arg7[%c0_36, %c17_37, %c0_38], %59 {strides = array<i32>} : memref<2x18x128xf32, #tpu.memory_space<vmem>>, vector<2x1x128xf32>,
    %62 = vector.shape_cast %58 : vector<32x128xf32> to vector<2x16x128xf32>
    %c0_39 = arith.constant 0 : index
    %c1_40 = arith.constant 1 : index
    %c0_41 = arith.constant 0 : index
    %63 = vector.load %arg7[%c0_39, %c1_40, %c0_41] : memref<2x18x128xf32, #tpu.memory_space<vmem>>, vector<2x16x128xf32>
    tpu.vector_store %arg7[%c0_39, %c1_40, %c0_41], %62 {strides = array<i32>} : memref<2x18x128xf32, #tpu.memory_space<vmem>>, vector<2x16x128xf32>,
    %c0_42 = arith.constant 0 : index
    %c0_43 = arith.constant 0 : index
    %c0_44 = arith.constant 0 : index
    %64 = vector.load %arg7[%c0_42, %c0_43, %c0_44] : memref<2x18x128xf32, #tpu.memory_space<vmem>>, vector<2x16x128xf32>
    %c0_45 = arith.constant 0 : index
    %c1_46 = arith.constant 1 : index
    %c0_47 = arith.constant 0 : index
    %65 = vector.load %arg7[%c0_45, %c1_46, %c0_47] : memref<2x18x128xf32, #tpu.memory_space<vmem>>, vector<2x16x128xf32>
    %c0_48 = arith.constant 0 : index
    %c2_49 = arith.constant 2 : index
    %c0_50 = arith.constant 0 : index
    %66 = vector.load %arg7[%c0_48, %c2_49, %c0_50] : memref<2x18x128xf32, #tpu.memory_space<vmem>>, vector<2x16x128xf32>
    %67 = tpu.concatenate %64, %65, %66 in 2 : vector<2x16x128xf32>, vector<2x16x128xf32>, vector<2x16x128xf32> -> vector<2x16x384xf32>
    %68 = vector.shape_cast %67 : vector<2x16x384xf32> to vector<32x384xf32>
    %69 = arith.truncf %68 : vector<32x384xf32> to vector<32x384xbf16>
    %c0_51 = arith.constant 0 : index
    %c0_52 = arith.constant 0 : index
    %70 = vector.load %arg3[%c0_51, %c0_52] : memref<384x128xbf16, #tpu.memory_space<vmem>>, vector<384x128xbf16>
    %cst_53 = arith.constant dense<0.000000e+00> : vector<32x128xf32>
    %71 = tpu.matmul %69, %70, %cst_53 {dimension_numbers = #tpu.dot_dimension_numbers<[1], [0], [0], [1], [0, 0, 1, 1], [], []>} : vector<32x384xbf16>, vector<384x128xbf16>, vector<32x128xf32> -> vector<32x128xf32>
    %c0_54 = arith.constant 0 : index
    %c0_55 = arith.constant 0 : index
    %72 = vector.load %arg4[%c0_54, %c0_55] : memref<3x128xf32, #tpu.memory_space<vmem>>, vector<3x128xf32>
    %73 = vector.extract_strided_slice %72 {offsets = [0, 0], sizes = [1, 128], strides = [1, 1]} : vector<3x128xf32> to vector<1x128xf32>
    %74 = vector.broadcast %73 : vector<1x128xf32> to vector<32x128xf32>
    %75 = arith.addf %71, %74 : vector<32x128xf32>
    %cst_56 = arith.constant dense<0.000000e+00> : vector<128xf32>
    %76 = vector.multi_reduction <add>, %75, %cst_56 [0] : vector<32x128xf32> to vector<128xf32>
    %77 = vector.shape_cast %76 : vector<128xf32> to vector<1x128xf32>
    %c8_i32_57 = arith.constant 8 : i32
    %78 = tpu.dynamic_rotate %77 by %c8_i32_57 dim 1 : vector<1x128xf32>, i32 -> vector<1x128xf32>
    %79 = arith.addf %77, %78 : vector<1x128xf32>
    %c16_i32_58 = arith.constant 16 : i32
    %80 = tpu.dynamic_rotate %79 by %c16_i32_58 dim 1 : vector<1x128xf32>, i32 -> vector<1x128xf32>
    %81 = arith.addf %79, %80 : vector<1x128xf32>
    %c32_i32_59 = arith.constant 32 : i32
    %82 = tpu.dynamic_rotate %81 by %c32_i32_59 dim 1 : vector<1x128xf32>, i32 -> vector<1x128xf32>
    %83 = arith.addf %81, %82 : vector<1x128xf32>
    %c64_i32_60 = arith.constant 64 : i32
    %84 = tpu.dynamic_rotate %83 by %c64_i32_60 dim 1 : vector<1x128xf32>, i32 -> vector<1x128xf32>
    %85 = arith.addf %83, %84 : vector<1x128xf32>
    %86 = arith.mulf %75, %75 : vector<32x128xf32>
    %cst_61 = arith.constant dense<0.000000e+00> : vector<128xf32>
    %87 = vector.multi_reduction <add>, %86, %cst_61 [0] : vector<32x128xf32> to vector<128xf32>
    %88 = vector.shape_cast %87 : vector<128xf32> to vector<1x128xf32>
    %c8_i32_62 = arith.constant 8 : i32
    %89 = tpu.dynamic_rotate %88 by %c8_i32_62 dim 1 : vector<1x128xf32>, i32 -> vector<1x128xf32>
    %90 = arith.addf %88, %89 : vector<1x128xf32>
    %c16_i32_63 = arith.constant 16 : i32
    %91 = tpu.dynamic_rotate %90 by %c16_i32_63 dim 1 : vector<1x128xf32>, i32 -> vector<1x128xf32>
    %92 = arith.addf %90, %91 : vector<1x128xf32>
    %c32_i32_64 = arith.constant 32 : i32
    %93 = tpu.dynamic_rotate %92 by %c32_i32_64 dim 1 : vector<1x128xf32>, i32 -> vector<1x128xf32>
    %94 = arith.addf %92, %93 : vector<1x128xf32>
    %c64_i32_65 = arith.constant 64 : i32
    %95 = tpu.dynamic_rotate %94 by %c64_i32_65 dim 1 : vector<1x128xf32>, i32 -> vector<1x128xf32>
    %96 = arith.addf %94, %95 : vector<1x128xf32>
    %cst_66 = arith.constant 0.001953125 : f32
    %97 = vector.broadcast %cst_66 : f32 to vector<1x128xf32>
    %98 = arith.mulf %85, %97 : vector<1x128xf32>
    %cst_67 = arith.constant 0.001953125 : f32
    %99 = vector.broadcast %cst_67 : f32 to vector<1x128xf32>
    %100 = arith.mulf %96, %99 : vector<1x128xf32>
    %101 = arith.mulf %98, %98 : vector<1x128xf32>
    %102 = arith.subf %100, %101 : vector<1x128xf32>
    %cst_68 = arith.constant 9.99999974E-6 : f32
    %103 = vector.broadcast %cst_68 : f32 to vector<1x128xf32>
    %104 = arith.addf %102, %103 : vector<1x128xf32>
    %105 = math.rsqrt %104 : vector<1x128xf32>
    %106 = vector.broadcast %98 : vector<1x128xf32> to vector<32x128xf32>
    %107 = arith.subf %75, %106 : vector<32x128xf32>
    %108 = vector.broadcast %105 : vector<1x128xf32> to vector<32x128xf32>
    %109 = arith.mulf %107, %108 : vector<32x128xf32>
    %110 = vector.extract_strided_slice %72 {offsets = [1, 0], sizes = [1, 128], strides = [1, 1]} : vector<3x128xf32> to vector<1x128xf32>
    %111 = vector.broadcast %110 : vector<1x128xf32> to vector<32x128xf32>
    %112 = arith.mulf %109, %111 : vector<32x128xf32>
    %113 = vector.extract_strided_slice %72 {offsets = [2, 0], sizes = [1, 128], strides = [1, 1]} : vector<3x128xf32> to vector<1x128xf32>
    %114 = vector.broadcast %113 : vector<1x128xf32> to vector<32x128xf32>
    %115 = arith.addf %112, %114 : vector<32x128xf32>
    %cst_69 = arith.constant 0.000000e+00 : f32
    %116 = vector.broadcast %cst_69 : f32 to vector<32x128xf32>
    %117 = arith.maximumf %115, %116 : vector<32x128xf32>
    %c0_70 = arith.constant 0 : index
    %c0_71 = arith.constant 0 : index
    %118 = vector.load %arg5[%c0_70, %c0_71] : memref<32x128xf32, #tpu.memory_space<vmem>>, vector<32x128xf32>
    tpu.vector_store %arg5[%c0_70, %c0_71], %117 {strides = array<i32>} : memref<32x128xf32, #tpu.memory_space<vmem>>, vector<32x128xf32>,
    return
  }
}

</mosaic_0001>

<bundles_post_ra>
// kernel: tile.33
= control target key start
LH: loop header
LB: loop body
LE: loop exit
PB: predicated region body
PF: predicated region fallthrough
CT: control target
= control target key end

     0   :  { %s28_s0 = inlined_call_operand.vmem [shape: f32[8], index: 0, kind: input, shape index: {}]   ;;  %s29_s1 = inlined_call_operand.vmem [shape: f32[16,8], index: 1, kind: output, shape index: {}]  }
   0x1   :  { %v4_v0 = vld [vmem:[%s28_s0] ss:$0 sm:$0xff] }
   0x2   :  { %5 = vst [vmem:[%s29_s1] sm:$0xff] %v4_v0  ;;  %8 = vst [vmem:[%s29_s1 + $0x8] sm:$0xff] %v4_v0 }

// kernel: tile.42
= control target key start
LH: loop header
LB: loop body
LE: loop exit
PB: predicated region body
PF: predicated region fallthrough
CT: control target
= control target key end

     0   :  { %s131_s10 = smov 120   ;;  %s132_s11 = smov 104   ;;  %vm3_vm0 = vcmask 64512   ;;  %vm9_vm1 = vcmask 1048512   ;;  %vm15_vm2 = vcmask 982912   ;;  %vm21_vm3 = vcmask 917312   ;;  %s207_s0 = inlined_call_operand.vmem [shape: f32[16,8], index: 0, kind: input, shape index: {}]   ;;  %s208_s1 = inlined_call_operand.vmem [shape: f32[1,128], index: 1, kind: output, shape index: {}]  }
   0x1   :  { %v101_v0 = vld [vmem:[%s207_s0 + $0xf] sm:$0x1]   ;;  %v103_v1 = vld [vmem:[%s207_s0 + $0xd] sm:$0x1]   ;;  %v102_v2 = vld [vmem:[%s207_s0 + $0xe] sm:$0x1]  }
   0x2   :  { %7 = vrot.lane.b32.xlu0 %v101_v0, %s131_s10  ;;  %19 = vrot.lane.b32.xlu1 %v103_v1, %s132_s11  ;;  %v104_v3 = vld [vmem:[%s207_s0 + $0xc] sm:$0x1]   ;;  %s133_s16 = smov 112   ;;  %s134_s17 = smov 96   ;;  %v105_v4 = vld [vmem:[%s207_s0 + $0xb] sm:$0x1]  }
   0x3   :  { %v106_v5 = vld [vmem:[%s207_s0 + $0xa] sm:$0x1]   ;;  %v2_v6 = vld [vmem:[%s207_s0] sm:$0x1]   ;;  %s135_s24 = smov 88   ;;  %s136_s25 = smov 80  }
   0x4   :  { %4 = vst.msk [vmem:[#allocation0] sm:$0x1] %vm3_vm0, %v2_v6   ;;  %v107_v7 = vld [vmem:[%s207_s0 + $0x9] sm:$0x1]   ;;  %v108_v8 = vld [vmem:[%s207_s0 + $0x8] sm:$0x1]  }
   0x5   :  { %s137_s30 = smov 72   ;;  %s138_s2 = smov 64   ;;  %v109_v9 = vld [vmem:[%s207_s0 + $0x7] sm:$0x1]   ;;  %v110_v10 = vld [vmem:[%s207_s0 + $0x6] sm:$0x1]  }
   0x6   :  { %13 = vrot.lane.b32.xlu0 %v102_v2, %s133_s16  ;;  %25 = vrot.lane.b32.xlu1 %v104_v3, %s134_s17  ;;  %s139_s7 = smov 56   ;;  %s140_s8 = smov 48   ;;  %v111_v11 = vld [vmem:[%s207_s0 + $0x5] sm:$0x1]   ;;  %v112_v12 = vld [vmem:[%s207_s0 + $0x4] sm:$0x1]  }
   0x7   :  { %s141_s13 = smov 40   ;;  %s142_s14 = smov 32   ;;  %v113_v13 = vld [vmem:[%s207_s0 + $0x3] sm:$0x1]   ;;  %v114_v14 = vld [vmem:[%s207_s0 + $0x2] sm:$0x1]  }
   0x8   :  { %s143_s19 = smov 24   ;;  %s144_s20 = smov 16   ;;  %v115_v15 = vld [vmem:[%s207_s0 + $0x1] sm:$0x1]   ;;  %vm27_vm4 = vcmask 851712   ;;  %vm33_vm5 = vcmask 786112  }
   0x9   :  { %s145_s0 = smov 8   ;;  %vm39_vm6 = vcmask 720512   ;;  %vm45_vm7 = vcmask 654912   ;;  %vm51_vm8 = vcmask 589312   ;;  %vm57_vm9 = vcmask 523712  }
   0xa   :  { %31 = vrot.lane.b32.xlu0 %v105_v4, %s135_s24  ;;  %37 = vrot.lane.b32.xlu1 %v106_v5, %s136_s25  ;;  %vm63_vm10 = vcmask 458112   ;;  %vm69_vm11 = vcmask 392512   ;;  %vm75_vm12 = vcmask 326912   ;;  %vm81_vm13 = vcmask 261312  }
   0xb   :  { %vm87_vm14 = vcmask 195712   ;;  %vm93_vm15 = vcmask 130112  }
   0xe   :  { %43 = vrot.lane.b32.xlu0 %v107_v7, %s137_s30  ;;  %49 = vrot.lane.b32.xlu1 %v108_v8, %s138_s2 }
  0x12   :  { %55 = vrot.lane.b32.xlu0 %v109_v9, %s139_s7  ;;  %61 = vrot.lane.b32.xlu1 %v110_v10, %s140_s8 }
  0x16   :  { %67 = vrot.lane.b32.xlu0 %v111_v11, %s141_s13  ;;  %73 = vrot.lane.b32.xlu1 %v112_v12, %s142_s14 }
  0x1a   :  { %79 = vrot.lane.b32.xlu0 %v113_v13, %s143_s19  ;;  %85 = vrot.lane.b32.xlu1 %v114_v14, %s144_s20 }
  0x1e   :  { %91 = vrot.lane.b32.xlu0 %v115_v15, %s145_s0 }
  0x74   :  { %v8_v16 = vpop.permute.xlu0 %7   ;;  %v20_v17 = vpop.permute.xlu1 %19  }
  0x75   :  { %10 = vst.msk [vmem:[#allocation0] sm:$0x1] %vm9_vm1, %v8_v16  }
  0x78   :  { %v14_v18 = vpop.permute.xlu0 %13   ;;  %v26_v19 = vpop.permute.xlu1 %25  }
  0x79   :  { %16 = vst.msk [vmem:[#allocation0] sm:$0x1] %vm15_vm2, %v14_v18  }
  0x7a   :  { %22 = vst.msk [vmem:[#allocation0] sm:$0x1] %vm21_vm3, %v20_v17  }
  0x7b   :  { %28 = vst.msk [vmem:[#allocation0] sm:$0x1] %vm27_vm4, %v26_v19  }
  0x7c   :  { %v32_v20 = vpop.permute.xlu0 %31   ;;  %v38_v21 = vpop.permute.xlu1 %37  }
  0x7d   :  { %34 = vst.msk [vmem:[#allocation0] sm:$0x1] %vm33_vm5, %v32_v20  }
  0x7e   :  { %40 = vst.msk [vmem:[#allocation0] sm:$0x1] %vm39_vm6, %v38_v21  }
  0x80   :  { %v44_v22 = vpop.permute.xlu0 %43   ;;  %v50_v23 = vpop.permute.xlu1 %49  }
  0x81   :  { %46 = vst.msk [vmem:[#allocation0] sm:$0x1] %vm45_vm7, %v44_v22  }
  0x82   :  { %52 = vst.msk [vmem:[#allocation0] sm:$0x1] %vm51_vm8, %v50_v23  }
  0x84   :  { %v56_v24 = vpop.permute.xlu0 %55   ;;  %v62_v25 = vpop.permute.xlu1 %61  }
  0x85   :  { %58 = vst.msk [vmem:[#allocation0] sm:$0x1] %vm57_vm9, %v56_v24  }
  0x86   :  { %64 = vst.msk [vmem:[#allocation0] sm:$0x1] %vm63_vm10, %v62_v25  }
  0x88   :  { %v68_v26 = vpop.permute.xlu0 %67   ;;  %v74_v27 = vpop.permute.xlu1 %73  }
  0x89   :  { %70 = vst.msk [vmem:[#allocation0] sm:$0x1] %vm69_vm11, %v68_v26  }
  0x8a   :  { %76 = vst.msk [vmem:[#allocation0] sm:$0x1] %vm75_vm12, %v74_v27  }
  0x8c   :  { %v80_v28 = vpop.permute.xlu0 %79   ;;  %v86_v29 = vpop.permute.xlu1 %85  }
  0x8d   :  { %82 = vst.msk [vmem:[#allocation0] sm:$0x1] %vm81_vm13, %v80_v28  }
  0x8e   :  { %88 = vst.msk [vmem:[#allocation0] sm:$0x1] %vm87_vm14, %v86_v29  }
  0x90   :  { %v92_v30 = vpop.permute.xlu0 %91  }
  0x91   :  { %94 = vst.msk [vmem:[#allocation0] sm:$0x1] %vm93_vm15, %v92_v30  }
  0x98   :  { %v98_v31 = vld [vmem:[#allocation0] sm:$0x1] }
  0x99   :  { %100 = vst [vmem:[%s208_s1] sm:$0x1] %v98_v31 }

// kernel: conv_block_forward.1
= control target key start
LH: loop header
LB: loop body
LE: loop exit
PB: predicated region body
PF: predicated region fallthrough
CT: control target
= control target key end

     0   :  { %vm30_vm0 = vcmask 523264   ;;  %vm21_vm1 = vcmask 516096   ;;  %v884_v3 = vmov 0   ;;  %v885_v4 = vmov 0.0   ;;  %s888_s26 = smov 16   ;;  %s889_s27 = smov 32   ;;  %s1165_s0 = inlined_call_operand.vmem [shape: f32[2,16,64], index: 0, kind: input, shape index: {}]   ;;  %s1166_s1 = inlined_call_operand.vmem [shape: bf16[192,128], index: 1, kind: input, shape index: {}]   ;;  %s1167_s2 = inlined_call_operand.vmem [shape: f32[3,128], index: 2, kind: input, shape index: {}]   ;;  %s1168_s3 = inlined_call_operand.vmem [shape: bf16[384,128], index: 3, kind: input, shape index: {}]   ;;  %s1169_s4 = inlined_call_operand.vmem [shape: f32[3,128], index: 4, kind: input, shape index: {}]   ;;  %s1170_s5 = inlined_call_operand.vmem [shape: f32[32,128], index: 5, kind: output, shape index: {}]  }
   0x1   :  { %v26_v0 = vld [vmem:[%s1165_s0] sm:$0xff]  ;;  %v27_v1 = vld [vmem:[%s1165_s0 + $0x8] sm:$0xff]  ;;  %v28_v2 = vld [vmem:[%s1165_s0 + $0x10] sm:$0xff]  ;;  %178 = vmatprep.subr.bf16.mxu0 %v884_v3  ;;  %24 = vst.msk [vmem:[#allocation2 + $0x11] sm:$0x1] %vm21_vm1, %v885_v4  ;;  %v96_v46 = vlaneseq }
   0x2   :  { %22 = vst.msk [vmem:[#allocation2] sm:$0x1] %vm21_vm1, %v885_v4  ;;  %23 = vst.msk [vmem:[#allocation2 + $0x18] sm:$0x1] %vm21_vm1, %v885_v4  ;;  %v29_v5 = vld [vmem:[%s1165_s0 + $0x18] sm:$0xff]  ;;  %v844_v6 = vld [vmem:[%s1166_s1] sm:$0xff]  }
   0x3   :  { %25 = vst.msk [vmem:[#allocation2 + $0x29] sm:$0x1] %vm21_vm1, %v885_v4  ;;  %315 = vst [vmem:[#allocation3] sm:$0x1] %v885_v4  ;;  %179 = vmatpush1.bf16.msra.mxu0 %v844_v6  ;;  %v845_v7 = vld [vmem:[%s1166_s1 + $0x8] sm:$0xff]   ;;  %v846_v8 = vld [vmem:[%s1166_s1 + $0x10] sm:$0xff]  }
   0x4   :  { %316 = vst [vmem:[#allocation3 + $0x18] sm:$0x1] %v885_v4  ;;  %317 = vst [vmem:[#allocation3 + $0x11] sm:$0x1] %v885_v4  ;;  %180 = vmatprep.subr.bf16.mxu0 %v884_v3  ;;  %s886_s0 = smov 64   ;;  %v847_v15 = vld [vmem:[%s1166_s1 + $0x18] sm:$0xff]  }
   0x5   :  { %318 = vst [vmem:[#allocation3 + $0x29] sm:$0x1] %v885_v4  ;;  %31 = vst.msk [vmem:[#allocation2 + $0x1] sm:$0xff] %vm30_vm0, %v26_v0  ;;  %v848_v18 = vld [vmem:[%s1166_s1 + $0x20] sm:$0xff]   ;;  %v849_v20 = vld [vmem:[%s1166_s1 + $0x28] sm:$0xff]   ;;  %v980_v47 = vshrl.u32 %v96_v46, 7 }
   0x6   :  { %32 = vst.msk [vmem:[#allocation2 + $0x9] sm:$0xff] %vm30_vm0, %v27_v1  ;;  %33 = vst.msk [vmem:[#allocation2 + $0x19] sm:$0xff] %vm30_vm0, %v28_v2  ;;  %v850_v21 = vld [vmem:[%s1166_s1 + $0x30] sm:$0xff]   ;;  %v851_v22 = vld [vmem:[%s1166_s1 + $0x38] sm:$0xff]  }
   0x7   :  { %34 = vst.msk [vmem:[#allocation2 + $0x21] sm:$0xff] %vm30_vm0, %v29_v5  ;;  %181 = vmatpush1.bf16.msra.mxu0 %v845_v7  ;;  %v852_v23 = vld [vmem:[%s1166_s1 + $0x40] sm:$0xff]   ;;  %v853_v24 = vld [vmem:[%s1166_s1 + $0x48] sm:$0xff]   ;;  %v854_v25 = vld [vmem:[%s1166_s1 + $0x50] sm:$0xff]   ;;  %v983_v48 = vsub.s32 0, %v980_v47 }
   0x8   :  { %182 = vmatprep.subr.bf16.mxu0 %v884_v3  ;;  %v855_v26 = vld [vmem:[%s1166_s1 + $0x58] sm:$0xff]   ;;  %v988_v49 = vld [vmem:[%s1167_s2] sm:$0x7]  ;;  %s887_s2 = smov 8   ;;  %v869_v46 = vld [vmem:[%s1168_s3 + $0x30] sm:$0xff]  }
   0x9   :  { %v99_v51 = vrot.slane %v988_v49, %v983_v48 }
   0xb   :  { %183 = vmatpush1.bf16.msra.mxu0 %v846_v8 }
   0xc   :  { %v39_v9 = vld [vmem:[#allocation2 + $0x1] sm:$0xff]  ;;  %184 = vmatprep.subr.bf16.mxu0 %v884_v3 }
   0xd   :  { %v40_v10 = vld [vmem:[#allocation2 + $0x9] sm:$0xff]  ;;  %v41_v11 = vld [vmem:[#allocation2 + $0x19] sm:$0xff] }
   0xe   :  { %v834_v12 = vpack.i.bf16 %v40_v10, %v39_v9  ;;  %v42_v13 = vld [vmem:[#allocation2 + $0x21] sm:$0xff]  ;;  %v44_v17 = vld [vmem:[#allocation2 + $0xa] sm:$0xff]  ;;  %v37_v39 = vld [vmem:[#allocation2 + $0x18] sm:$0xff] }
   0xf   :  { %v839_v14 = vpack.i.bf16 %v42_v13, %v41_v11  ;;  %v43_v16 = vld [vmem:[#allocation2 + $0x2] sm:$0xff]  ;;  %185 = vmatpush1.bf16.msra.mxu0 %v847_v15  ;;  %v45_v30 = vld [vmem:[#allocation2 + $0x1a] sm:$0xff] }
  0x10   :  { %835 = vrot.lane.b32.xlu0 %v834_v12, %s886_s0  ;;  %v68_v19 = vpack.c.bf16 %v44_v17, %v43_v16  ;;  %186 = vmatprep.subr.bf16.mxu0 %v884_v3  ;;  %v35_v27 = vld [vmem:[#allocation2] sm:$0xff]  ;;  %v36_v29 = vld [vmem:[#allocation2 + $0x8] sm:$0xff] }
  0x11   :  { %v46_v31 = vld [vmem:[#allocation2 + $0x22] sm:$0xff] }
  0x12   :  { %744 = vmatprep.mubr.msk.bf16.mxu0 %vm30_vm0, %v68_v19  ;;  %v70_v36 = vpack.c.bf16 %v46_v31, %v45_v30  ;;  %v38_v40 = vld [vmem:[#allocation2 + $0x20] sm:$0xff] }
  0x13   :  { %187 = vmatpush1.bf16.msra.mxu0 %v848_v18  ;;  %v857_v31 = vld [vmem:[%s1168_s3] sm:$0xff]  }
  0x14   :  { %840 = vrot.lane.b32.xlu0 %v839_v14, %s886_s0  ;;  %188 = vmatprep.subr.bf16.mxu0 %v884_v3 }
  0x17   :  { %189 = vmatpush1.bf16.msra.mxu0 %v849_v20 }
  0x18   :  { %190 = vmatprep.subr.bf16.mxu0 %v884_v3 }
  0x1b   :  { %191 = vmatpush1.bf16.msra.mxu0 %v850_v21 }
  0x1c   :  { %192 = vmatprep.subr.bf16.mxu0 %v884_v3 }
  0x1f   :  { %193 = vmatpush1.bf16.msra.mxu0 %v851_v22 }
  0x20   :  { %194 = vmatprep.subr.bf16.mxu0 %v884_v3 }
  0x23   :  { %195 = vmatpush1.bf16.msra.mxu0 %v852_v23 }
  0x24   :  { %196 = vmatprep.subr.bf16.mxu0 %v884_v3 }
  0x27   :  { %197 = vmatpush1.bf16.msra.mxu0 %v853_v24 }
  0x28   :  { %198 = vmatprep.subr.bf16.mxu0 %v884_v3 }
  0x2b   :  { %199 = vmatpush1.bf16.msra.mxu0 %v854_v25 }
  0x2c   :  { %200 = vmatprep.subr.bf16.mxu0 %v884_v3 }
  0x2f   :  { %201 = vmatpush1.bf16.msra.mxu0 %v855_v26 }
  0x82   :  { %v836_v28 = vpop.permute.xlu0 %835 }
  0x83   :  { %v838_v32 = vunpack.i.h.bf16 %v836_v28  ;;  %v837_v33 = vunpack.i.l.bf16 %v836_v28 }
  0x85   :  { %v63_v34 = vsel %vm30_vm0, %v35_v27, %v837_v33  ;;  %v64_v35 = vsel %vm30_vm0, %v36_v29, %v838_v32  ;;  %v856_v29 = vld [vmem:[%s1168_s3 + $0x40] sm:$0xff]   ;;  %v858_v33 = vld [vmem:[%s1168_s3 + $0x48] sm:$0xff]  }
  0x86   :  { %v67_v37 = vpack.c.bf16 %v64_v35, %v63_v34  ;;  %v841_v38 = vpop.permute.xlu0 %840  ;;  %770 = vmatprep.subr.bf16.mxu1 %v856_v29  ;;  %v859_v35 = vld [vmem:[%s1168_s3 + $0x8] sm:$0xff]  }
  0x87   :  { %v843_v41 = vunpack.i.h.bf16 %v841_v38  ;;  %v842_v42 = vunpack.i.l.bf16 %v841_v38  ;;  %771 = vmatpush3.bf16.msra.mxu1 %v857_v31  ;;  %v861_v38 = vld [vmem:[%s1168_s3 + $0x10] sm:$0xff]  }
  0x88   :  { %211 = vmatmul.mubr.bf16.vlgmr.msra.gmra.mrb[0].mxu0 %v67_v37  ;;  %772 = vmatprep.subr.bf16.mxu1 %v858_v33  ;;  %v860_v37 = vld [vmem:[%s1168_s3 + $0x50] sm:$0xff]  }
  0x89   :  { %745 = vmatprep.mubr.msk.bf16.mxu0 %vm30_vm0, %v70_v36  ;;  %v65_v43 = vsel %vm30_vm0, %v37_v39, %v842_v42  ;;  %v66_v44 = vsel %vm30_vm0, %v38_v40, %v843_v41  ;;  %v862_v39 = vld [vmem:[%s1168_s3 + $0x58] sm:$0xff]   ;;  %v864_v41 = vld [vmem:[%s1168_s3 + $0x60] sm:$0xff]  }
  0x8a   :  { %v69_v45 = vpack.c.bf16 %v66_v44, %v65_v43  ;;  %v863_v40 = vld [vmem:[%s1168_s3 + $0x18] sm:$0xff]   ;;  %v865_v42 = vld [vmem:[%s1168_s3 + $0x20] sm:$0xff]   ;;  %v866_v43 = vld [vmem:[%s1168_s3 + $0x68] sm:$0xff]  }
  0x8b   :  { %773 = vmatpush3.bf16.msra.mxu1 %v859_v35  ;;  %v867_v44 = vld [vmem:[%s1168_s3 + $0x28] sm:$0xff]  }
  0x8c   :  { %774 = vmatprep.subr.bf16.mxu1 %v860_v37 }
  0x8f   :  { %775 = vmatpush3.bf16.msra.mxu1 %v861_v38  ;;  %v876_v38 = vld [vmem:[%s1168_s3 + $0xa0] sm:$0xff]  }
  0x90   :  { %219 = vmatmul.mubr.bf16.gmra.mrb[4].mxu0 %v69_v45  ;;  %776 = vmatprep.subr.bf16.mxu1 %v862_v39  ;;  %v868_v45 = vld [vmem:[%s1168_s3 + $0x70] sm:$0xff]   ;;  %v877_v39 = vld [vmem:[%s1168_s3 + $0xa8] sm:$0xff]  }
  0x93   :  { %777 = vmatpush3.bf16.msra.mxu1 %v863_v40  ;;  %v878_v40 = vld [vmem:[%s1168_s3 + $0xb0] sm:$0xff]  }
  0x94   :  { %778 = vmatprep.subr.bf16.mxu1 %v864_v41  ;;  %v879_v41 = vld [vmem:[%s1168_s3 + $0xb8] sm:$0xff]  }
  0x97   :  { %779 = vmatpush3.bf16.msra.mxu1 %v865_v42 }
  0x98   :  { %780 = vmatprep.subr.bf16.mxu1 %v866_v43 }
  0x9b   :  { %781 = vmatpush3.bf16.msra.mxu1 %v867_v44 }
  0x9c   :  { %782 = vmatprep.subr.bf16.mxu1 %v868_v45 }
  0x9f   :  { %783 = vmatpush3.bf16.msra.mxu1 %v869_v46 }
 0x15b   :  { %v212_v50 = vpop.f32.mrb[0].mxu0 }
 0x15c   :  { %v214_v52 = vpop.f32.mrb[1].mxu0  ;;  %v994_v56 = vadd.f32 %v212_v50, %v99_v51  ;;  %v870_v50 = vld [vmem:[%s1168_s3 + $0x78] sm:$0xff]  }
 0x15d   :  { %v215_v53 = vpop.f32.mrb[2].mxu0  ;;  %784 = vmatprep.subr.bf16.mxu1 %v870_v50  ;;  %v872_v52 = vld [vmem:[%s1168_s3 + $0x80] sm:$0xff]  }
 0x15e   :  { %v992_v54 = vadd.f32 %v215_v53, %v99_v51  ;;  %v217_v55 = vpop.f32.mrb[3].mxu0  ;;  %v248_v59 = vmul.f32 %v994_v56, %v994_v56 }
 0x160   :  { %v249_v57 = vmul.f32 %v992_v54, %v992_v54  ;;  %v227_v60 = vadd.f32 %v992_v54, %v994_v56 }
 0x162   :  { %v252_v0 = vadd.f32 %v249_v57, %v248_v59 }
 0x163   :  { %v220_v58 = vpop.f32.mrb[4].mxu0 }
 0x164   :  { %v1002_v61 = vadd.f32 %v220_v58, %v99_v51  ;;  %v222_v62 = vpop.f32.mrb[5].mxu0 }
 0x165   :  { %v223_v63 = vpop.f32.mrb[6].mxu0 }
 0x166   :  { %v228_v1 = vadd.f32 %v227_v60, %v1002_v61  ;;  %v250_v2 = vmul.f32 %v1002_v61, %v1002_v61  ;;  %v1007_v3 = vadd.f32 %v223_v63, %v99_v51  ;;  %v225_v4 = vpop.f32.mrb[7].mxu0  ;;  %v871_v51 = vld [vmem:[%s1168_s3 + $0x38] sm:$0xff]  }
 0x167   :  { %785 = vmatpush3.bf16.msra.mxu1 %v871_v51  ;;  %v305_v4 = vsub.s32 2, %v980_v47 }
 0x168   :  { %v253_v5 = vadd.f32 %v252_v0, %v250_v2  ;;  %v229_v6 = vadd.f32 %v228_v1, %v1007_v3  ;;  %v251_v7 = vmul.f32 %v1007_v3, %v1007_v3  ;;  %808 = vmatprep.subr.bf16.mxu1 %v872_v52  ;;  %v297_v1 = vsub.s32 1, %v980_v47 }
 0x16a   :  { %v230_v8 = vrot.slane %v229_v6, 4  ;;  %v254_v9 = vadd.f32 %v253_v5, %v251_v7 }
 0x16c   :  { %v255_v10 = vrot.slane %v254_v9, 4  ;;  %v231_v11 = vadd.f32 %v230_v8, %v229_v6  ;;  %v298_v6 = vrot.slane %v988_v49, %v297_v1 }
 0x16e   :  { %v232_v12 = vrot.slane %v231_v11, 2  ;;  %v256_v13 = vadd.f32 %v255_v10, %v254_v9 }
 0x170   :  { %v233_v14 = vadd.f32 %v232_v12, %v231_v11  ;;  %v257_v15 = vrot.slane %v256_v13, 2  ;;  %v306_v12 = vrot.slane %v988_v49, %v305_v4 }
 0x172   :  { %v234_v16 = vrot.slane %v233_v14, 1  ;;  %v258_v17 = vadd.f32 %v257_v15, %v256_v13 }
 0x174   :  { %v235_v18 = vadd.f32 %v234_v16, %v233_v14  ;;  %v259_v19 = vrot.slane %v258_v17, 1 }
 0x176   :  { %236 = vrot.lane.b32.xlu1 %v235_v18, %s887_s2  ;;  %v260_v20 = vadd.f32 %v259_v19, %v258_v17 }
 0x17a   :  { %261 = vrot.lane.b32.xlu1 %v260_v20, %s887_s2 }
 0x1e8   :  { %v237_v21 = vpop.permute.xlu1 %236 }
 0x1e9   :  { %v238_v22 = vadd.f32 %v237_v21, %v235_v18 }
 0x1eb   :  { %239 = vrot.lane.b32.xlu0 %v238_v22, %s888_s26 }
 0x1ec   :  { %v262_v23 = vpop.permute.xlu1 %261 }
 0x1ed   :  { %v263_v24 = vadd.f32 %v262_v23, %v260_v20 }
 0x1ef   :  { %264 = vrot.lane.b32.xlu1 %v263_v24, %s888_s26 }
 0x25d   :  { %v240_v25 = vpop.permute.xlu0 %239 }
 0x25e   :  { %v241_v26 = vadd.f32 %v240_v25, %v238_v22 }
 0x260   :  { %242 = vrot.lane.b32.xlu0 %v241_v26, %s889_s27 }
 0x261   :  { %v265_v27 = vpop.permute.xlu1 %264 }
 0x262   :  { %v266_v28 = vadd.f32 %v265_v27, %v263_v24 }
 0x264   :  { %267 = vrot.lane.b32.xlu1 %v266_v28, %s889_s27 }
 0x2d2   :  { %v243_v30 = vpop.permute.xlu0 %242 }
 0x2d3   :  { %v244_v32 = vadd.f32 %v243_v30, %v241_v26  ;;  %v874_v30 = vld [vmem:[%s1168_s3 + $0x90] sm:$0xff]  }
 0x2d5   :  { %245 = vrot.lane.b32.xlu0 %v244_v32, %s886_s0 }
 0x2d6   :  { %v268_v34 = vpop.permute.xlu1 %267 }
 0x2d7   :  { %v269_v36 = vadd.f32 %v268_v34, %v266_v28  ;;  %v873_v28 = vld [vmem:[%s1168_s3 + $0x88] sm:$0xff]  }
 0x2d9   :  { %270 = vrot.lane.b32.xlu1 %v269_v36, %s886_s0 }
 0x347   :  { %v246_v53 = vpop.permute.xlu0 %245 }
 0x348   :  { %v247_v55 = vadd.f32 %v246_v53, %v244_v32 }
 0x34a   :  { %v273_v57 = vmul.f32 0.001953125, %v247_v55 }
 0x34b   :  { %v271_v58 = vpop.permute.xlu1 %270 }
 0x34c   :  { %v272_v59 = vadd.f32 %v271_v58, %v269_v36  ;;  %v275_v60 = vmul.f32 %v273_v57, %v273_v57  ;;  %v282_v2 = vrot.slane %v273_v57, %v983_v48  ;;  %v875_v36 = vld [vmem:[%s1168_s3 + $0x98] sm:$0xff]  }
 0x34e   :  { %v274_v62 = vmul.f32 0.001953125, %v272_v59  ;;  %v283_v7 = vsub.f32 %v994_v56, %v282_v2  ;;  %v284_v8 = vsub.f32 %v992_v54, %v282_v2  ;;  %v285_v9 = vsub.f32 %v1002_v61, %v282_v2 }
 0x34f   :  { %v286_v10 = vsub.f32 %v1007_v3, %v282_v2 }
 0x350   :  { %v276_v63 = vsub.f32 %v274_v62, %v275_v60 }
 0x352   :  { %v277_v0 = vadd.f32 1e-05, %v276_v63  ;;  %v1109_v63 = vld [vmem:[%s1169_s4] sm:$0x7] }
 0x354   :  { %880 = vrsqrt.f32 %v277_v0  ;;  %v393_v0 = vrot.slane %v1109_v63, %v983_v48 }
 0x35e   :  { %v881_v5 = vpop.eup %880 }
 0x35f   :  { %v290_v11 = vrot.slane %v881_v5, %v983_v48 }
 0x361   :  { %v291_v13 = vmul.f32 %v290_v11, %v283_v7  ;;  %v292_v14 = vmul.f32 %v290_v11, %v284_v8  ;;  %v293_v15 = vmul.f32 %v290_v11, %v285_v9  ;;  %v294_v16 = vmul.f32 %v290_v11, %v286_v10 }
 0x363   :  { %v299_v17 = vmul.f32 %v298_v6, %v291_v13  ;;  %v300_v18 = vmul.f32 %v298_v6, %v292_v14  ;;  %v301_v19 = vmul.f32 %v298_v6, %v293_v15  ;;  %v302_v56 = vmul.f32 %v298_v6, %v294_v16 }
 0x365   :  { %v307_v20 = vadd.f32 %v306_v12, %v299_v17  ;;  %v308_v54 = vadd.f32 %v306_v12, %v300_v18  ;;  %v309_v21 = vadd.f32 %v306_v12, %v301_v19  ;;  %v310_v61 = vadd.f32 %v306_v12, %v302_v56 }
 0x367   :  { %v311_v22 = vmax.f32 %v307_v20, 0.0  ;;  %v312_v3 = vmax.f32 %v308_v54, 0.0  ;;  %v313_v23 = vmax.f32 %v309_v21, 0.0  ;;  %v314_v24 = vmax.f32 %v310_v61, 0.0 }
 0x369   :  { %319 = vst [vmem:[#allocation3 + $0x1] sm:$0xff] %v311_v22  ;;  %320 = vst [vmem:[#allocation3 + $0x9] sm:$0xff] %v312_v3  ;;  %v336_v49 = vpack.c.bf16 %v312_v3, %v311_v22  ;;  %v339_v29 = vpack.c.bf16 %v314_v24, %v313_v23 }
 0x36a   :  { %321 = vst [vmem:[#allocation3 + $0x19] sm:$0xff] %v313_v23  ;;  %322 = vst [vmem:[#allocation3 + $0x21] sm:$0xff] %v314_v24 }
 0x36b   :  { %570 = vmatprep.mubr.bf16.mxu1 %v336_v49 }
 0x370   :  { %v323_v25 = vld [vmem:[#allocation3] sm:$0xff]  ;;  %v324_v26 = vld [vmem:[#allocation3 + $0x8] sm:$0xff] }
 0x371   :  { %v335_v27 = vpack.c.bf16 %v324_v26, %v323_v25  ;;  %v325_v31 = vld [vmem:[#allocation3 + $0x18] sm:$0xff]  ;;  %v326_v32 = vld [vmem:[#allocation3 + $0x20] sm:$0xff]  ;;  %v332_v34 = vld [vmem:[#allocation3 + $0xa] sm:$0xff] }
 0x372   :  { %v331_v33 = vld [vmem:[#allocation3 + $0x2] sm:$0xff]  ;;  %v338_v35 = vpack.c.bf16 %v326_v32, %v325_v31  ;;  %v333_v42 = vld [vmem:[#allocation3 + $0x1a] sm:$0xff] }
 0x373   :  { %571 = vmatmul.mubr.bf16.vlgmr.msra.gmra.mrb[0].mxu1 %v335_v27  ;;  %v337_v37 = vpack.c.bf16 %v332_v34, %v331_v33  ;;  %v334_v43 = vld [vmem:[#allocation3 + $0x22] sm:$0xff] }
 0x374   :  { %809 = vmatpush3.bf16.msra.mxu1 %v872_v52  ;;  %578 = vmatprep.mubr.bf16.mxu1 %v339_v29  ;;  %v340_v44 = vpack.c.bf16 %v334_v43, %v333_v42 }
 0x375   :  { %810 = vmatprep.subr.bf16.mxu1 %v873_v28 }
 0x378   :  { %811 = vmatpush3.bf16.msra.mxu1 %v873_v28 }
 0x379   :  { %812 = vmatprep.subr.bf16.mxu1 %v874_v30 }
 0x37b   :  { %579 = vmatmul.mubr.bf16.gmra.mrb[4].mxu1 %v338_v35 }
 0x37c   :  { %813 = vmatpush3.bf16.msra.mxu1 %v874_v30  ;;  %824 = vmatprep.mubr.bf16.mxu1 %v337_v37 }
 0x37d   :  { %814 = vmatprep.subr.bf16.mxu1 %v875_v36 }
 0x380   :  { %815 = vmatpush3.bf16.msra.mxu1 %v875_v36 }
 0x381   :  { %816 = vmatprep.subr.bf16.mxu1 %v876_v38 }
 0x384   :  { %817 = vmatpush3.bf16.msra.mxu1 %v876_v38 }
 0x385   :  { %818 = vmatprep.subr.bf16.mxu1 %v877_v39 }
 0x388   :  { %819 = vmatpush3.bf16.msra.mxu1 %v877_v39 }
 0x389   :  { %820 = vmatprep.subr.bf16.mxu1 %v878_v40 }
 0x38c   :  { %821 = vmatpush3.bf16.msra.mxu1 %v878_v40 }
 0x38d   :  { %822 = vmatprep.subr.bf16.mxu1 %v879_v41 }
 0x390   :  { %823 = vmatpush3.bf16.msra.mxu1 %v879_v41 }
 0x393   :  { %825 = vmatmul.mubr.bf16.vlgmr.msra.gmra.mrb[8].mxu1 %v340_v44 }
 0x446   :  { %v786_v45 = vpop.f32.mrb[0].mxu1 }
 0x447   :  { %v787_v46 = vpop.f32.mrb[1].mxu1 }
 0x448   :  { %v788_v50 = vadd.f32 %v787_v46, %v786_v45  ;;  %v789_v51 = vpop.f32.mrb[2].mxu1 }
 0x449   :  { %v790_v52 = vpop.f32.mrb[3].mxu1 }
 0x44a   :  { %v791_v53 = vadd.f32 %v790_v52, %v789_v51  ;;  %v573_v6 = vadd.f32 %v788_v50, %v393_v0 }
 0x44c   :  { %v576_v12 = vadd.f32 %v791_v53, %v393_v0 }
 0x44e   :  { %v792_v55 = vpop.f32.mrb[4].mxu1 }
 0x44f   :  { %v793_v57 = vpop.f32.mrb[5].mxu1 }
 0x450   :  { %v794_v58 = vadd.f32 %v793_v57, %v792_v55  ;;  %v795_v59 = vpop.f32.mrb[6].mxu1 }
 0x451   :  { %v796_v60 = vpop.f32.mrb[7].mxu1 }
 0x452   :  { %v797_v62 = vadd.f32 %v796_v60, %v795_v59  ;;  %v581_v2 = vadd.f32 %v794_v58, %v393_v0 }
 0x454   :  { %v584_v9 = vadd.f32 %v797_v62, %v393_v0  ;;  %v707_v62 = vrot.slane %v1109_v63, %v297_v1 }
 0x466   :  { %v826_v5 = vpop.f32.mrb[8].mxu1 }
 0x467   :  { %v1113_v7 = vadd.f32 %v826_v5, %v581_v2  ;;  %v621_v8 = vpop.f32.mrb[9].mxu1 }
 0x468   :  { %v1115_v10 = vadd.f32 %v621_v8, %v573_v6  ;;  %v827_v11 = vpop.f32.mrb[10].mxu1 }
 0x469   :  { %v1117_v13 = vadd.f32 %v827_v11, %v584_v9  ;;  %v624_v14 = vpop.f32.mrb[11].mxu1  ;;  %v659_v19 = vmul.f32 %v1113_v7, %v1113_v7  ;;  %v715_v9 = vrot.slane %v1109_v63, %v305_v4 }
 0x46a   :  { %v1119_v15 = vadd.f32 %v624_v14, %v576_v12  ;;  %v657_v16 = vmul.f32 %v1115_v10, %v1115_v10 }
 0x46b   :  { %v660_v54 = vmul.f32 %v1117_v13, %v1117_v13 }
 0x46c   :  { %v636_v17 = vadd.f32 %v1119_v15, %v1115_v10  ;;  %v658_v18 = vmul.f32 %v1119_v15, %v1119_v15 }
 0x46e   :  { %v637_v56 = vadd.f32 %v636_v17, %v1113_v7  ;;  %v661_v20 = vadd.f32 %v658_v18, %v657_v16 }
 0x470   :  { %v638_v21 = vadd.f32 %v637_v56, %v1117_v13  ;;  %v662_v61 = vadd.f32 %v661_v20, %v659_v19 }
 0x472   :  { %v639_v22 = vrot.slane %v638_v21, 4  ;;  %v663_v3 = vadd.f32 %v662_v61, %v660_v54 }
 0x474   :  { %v640_v23 = vadd.f32 %v639_v22, %v638_v21  ;;  %v664_v24 = vrot.slane %v663_v3, 4 }
 0x476   :  { %v641_v49 = vrot.slane %v640_v23, 2  ;;  %v665_v25 = vadd.f32 %v664_v24, %v663_v3 }
 0x478   :  { %v642_v26 = vadd.f32 %v641_v49, %v640_v23  ;;  %v666_v27 = vrot.slane %v665_v25, 2 }
 0x47a   :  { %v643_v28 = vrot.slane %v642_v26, 1  ;;  %v667_v29 = vadd.f32 %v666_v27, %v665_v25 }
 0x47c   :  { %v644_v30 = vadd.f32 %v643_v28, %v642_v26  ;;  %v668_v31 = vrot.slane %v667_v29, 1 }
 0x47e   :  { %645 = vrot.lane.b32.xlu0 %v644_v30, %s887_s2  ;;  %v669_v32 = vadd.f32 %v668_v31, %v667_v29 }
 0x480   :  { %670 = vrot.lane.b32.xlu1 %v669_v32, %s887_s2 }
 0x4f0   :  { %v646_v33 = vpop.permute.xlu0 %645 }
 0x4f1   :  { %v647_v34 = vadd.f32 %v646_v33, %v644_v30 }
 0x4f2   :  { %v671_v35 = vpop.permute.xlu1 %670 }
 0x4f3   :  { %v672_v36 = vadd.f32 %v671_v35, %v669_v32  ;;  %648 = vrot.lane.b32.xlu0 %v647_v34, %s888_s26 }
 0x4f5   :  { %673 = vrot.lane.b32.xlu1 %v672_v36, %s888_s26 }
 0x565   :  { %v649_v37 = vpop.permute.xlu0 %648 }
 0x566   :  { %v650_v38 = vadd.f32 %v649_v37, %v647_v34 }
 0x567   :  { %v674_v39 = vpop.permute.xlu1 %673 }
 0x568   :  { %v675_v40 = vadd.f32 %v674_v39, %v672_v36  ;;  %651 = vrot.lane.b32.xlu0 %v650_v38, %s889_s27 }
 0x56a   :  { %676 = vrot.lane.b32.xlu1 %v675_v40, %s889_s27 }
 0x5da   :  { %v652_v41 = vpop.permute.xlu0 %651 }
 0x5db   :  { %v653_v42 = vadd.f32 %v652_v41, %v650_v38 }
 0x5dc   :  { %v677_v43 = vpop.permute.xlu1 %676 }
 0x5dd   :  { %v678_v44 = vadd.f32 %v677_v43, %v675_v40  ;;  %654 = vrot.lane.b32.xlu0 %v653_v42, %s886_s0 }
 0x5df   :  { %679 = vrot.lane.b32.xlu1 %v678_v44, %s886_s0 }
 0x64f   :  { %v655_v45 = vpop.permute.xlu0 %654 }
 0x650   :  { %v656_v46 = vadd.f32 %v655_v45, %v653_v42 }
 0x651   :  { %v680_v50 = vpop.permute.xlu1 %679 }
 0x652   :  { %v682_v51 = vmul.f32 0.001953125, %v656_v46  ;;  %v681_v52 = vadd.f32 %v680_v50, %v678_v44 }
 0x654   :  { %v684_v53 = vmul.f32 %v682_v51, %v682_v51  ;;  %v683_v55 = vmul.f32 0.001953125, %v681_v52  ;;  %v691_v59 = vrot.slane %v682_v51, %v983_v48 }
 0x656   :  { %v685_v57 = vsub.f32 %v683_v55, %v684_v53  ;;  %v692_v0 = vsub.f32 %v1115_v10, %v691_v59  ;;  %v693_v2 = vsub.f32 %v1119_v15, %v691_v59  ;;  %v694_v5 = vsub.f32 %v1113_v7, %v691_v59 }
 0x657   :  { %v695_v6 = vsub.f32 %v1117_v13, %v691_v59 }
 0x658   :  { %v686_v58 = vadd.f32 1e-05, %v685_v57 }
 0x65a   :  { %882 = vrsqrt.f32 %v686_v58 }
 0x664   :  { %v883_v60 = vpop.eup %882 }
 0x665   :  { %v699_v8 = vrot.slane %v883_v60, %v983_v48 }
 0x667   :  { %v700_v11 = vmul.f32 %v699_v8, %v692_v0  ;;  %v701_v12 = vmul.f32 %v699_v8, %v693_v2  ;;  %v702_v14 = vmul.f32 %v699_v8, %v694_v5  ;;  %v703_v16 = vmul.f32 %v699_v8, %v695_v6 }
 0x669   :  { %v708_v17 = vmul.f32 %v707_v62, %v700_v11  ;;  %v709_v1 = vmul.f32 %v707_v62, %v701_v12  ;;  %v710_v18 = vmul.f32 %v707_v62, %v702_v14  ;;  %v711_v10 = vmul.f32 %v707_v62, %v703_v16 }
 0x66b   :  { %v716_v19 = vadd.f32 %v715_v9, %v708_v17  ;;  %v717_v15 = vadd.f32 %v715_v9, %v709_v1  ;;  %v718_v56 = vadd.f32 %v715_v9, %v710_v18  ;;  %v719_v7 = vadd.f32 %v715_v9, %v711_v10 }
 0x66d   :  { %v720_v20 = vmax.f32 %v716_v19, 0.0  ;;  %v721_v13 = vmax.f32 %v717_v15, 0.0  ;;  %v722_v54 = vmax.f32 %v718_v56, 0.0  ;;  %v723_v48 = vmax.f32 %v719_v7, 0.0 }
 0x66f   :  { %724 = vst [vmem:[%s1170_s5] sm:$0xff] %v720_v20  ;;  %725 = vst [vmem:[%s1170_s5 + $0x8] sm:$0xff] %v721_v13 }
 0x670   :  { %726 = vst [vmem:[%s1170_s5 + $0x10] sm:$0xff] %v722_v54  ;;  %727 = vst [vmem:[%s1170_s5 + $0x18] sm:$0xff] %v723_v48 }

</bundles_post_ra>
